<compile_context>
chip_gen: v5e
topology: v5e:2x2
jax: 0.10.0
libtpu: 0.0.40
codegen_flags: <defaults>
</compile_context>

<pallas_src>
import functools

import jax
import jax.numpy as jnp
from jax import lax
from jax.experimental import pallas as pl
from jax.experimental.pallas import tpu as pltpu


_BIG_EXCLUDE = 1e30   # sentinel for already-selected neighbours inside the k-NN loop
_BIG_BATCH = 1e8      # cross-batch penalty folded into the augmented distance matmul
_FAR_PAD_SRC = 1e9    # padded source columns: always farther than any real candidate


# --------------------------------------------------------------------------------------
# Kernel
# --------------------------------------------------------------------------------------
def fp_kernel(src_aug_ref,    # (R, N)           f32  resident, lane dense
              x_augT_ref,     # (C_in_pad+1, N)  bf16 resident (features + ones row)
              tgt_aug_ref,    # (R, Tm)          f32  streamed
              x_skipT_ref,    # (C_skip_pad, Tm) bf16 streamed
              w1T_ref,        # (H, C_cat)       bf16 resident
              b1T_ref,        # (H, 1)           f32  resident
              w2T_ref,        # (C_out, H)       bf16 resident
              b2T_ref,        # (C_out, 1)       f32  resident
              o_ref,          # (C_out, Tm)      f32  output tile
              *, k, c_in_pad, chunk, n_chunks):
    # Loop-invariant loads, hoisted out of the chunk loop.  The single small transpose
    # realizes the "contract axis 0" cross term as a standard MXU matmul, done once.
    src_nr = src_aug_ref[...].T              # (N, R)
    x_augT = x_augT_ref[...]
    w1T = w1T_ref[...]
    w2T = w2T_ref[...]
    b1 = b1T_ref[...]
    b2 = b2T_ref[...]

    def chunk_body(c, carry):
        off = pl.multiple_of(c * chunk, 128)
        sl = pl.ds(off, chunk)

        # Augmented distance matmul (MXU):
        #   d2 = ||s||^2 + ||t||^2 - 2 s.t + BIG * [batch_s != batch_t]
        tgt_c = tgt_aug_ref[:, sl]                                        # (R, chunk)
        d2 = jnp.dot(src_nr, tgt_c, preferred_element_type=jnp.float32)   # (N, chunk)
        d2 = jnp.maximum(d2, 0.0)

        # k nearest neighbours; all inverse-squared-distance weights accumulated into one
        # matrix so the feature gather is a single matmul.
        # TODO(synk): exact-distance ties are all selected (PyG keeps the lowest index);
        # measure zero for real coordinates.
        w_mat = jnp.zeros_like(d2)
        for _ in range(k):
            dmin = jnp.min(d2, axis=0, keepdims=True)                     # (1, chunk) XLU
            mask = d2 <= dmin
            w = pl.reciprocal(jnp.maximum(dmin, 1e-16), approx=True)      # EUP
            w_mat = w_mat + jnp.where(mask, w, 0.0)
            d2 = jnp.where(mask, _BIG_EXCLUDE, d2)                        # exclude chosen

        # Single bf16 MXU gather; the trailing ones row of x_augT yields the weight sums.
        accT = jnp.dot(x_augT, w_mat.astype(jnp.bfloat16),
                       preferred_element_type=jnp.float32)                # (C_in_pad+1, chunk)
        x_interp = accT[:c_in_pad, :] * pl.reciprocal(
            accT[c_in_pad:c_in_pad + 1, :], approx=True)                  # knn_interpolate

        # Skip concat folded into one layer-1 matmul; MLP = Lin -> ReLU -> Lin (plain last).
        cat = jnp.concatenate([x_interp.astype(jnp.bfloat16),
                               x_skipT_ref[:, sl]], axis=0)               # (C_cat, chunk)
        h = jnp.maximum(jnp.dot(w1T, cat, preferred_element_type=jnp.float32) + b1, 0.0)
        out_c = jnp.dot(w2T, h.astype(jnp.bfloat16),
                        preferred_element_type=jnp.float32) + b2
        o_ref[:, sl] = out_c.astype(o_ref.dtype)
        return carry

    lax.fori_loop(0, n_chunks, chunk_body, 0)


# --------------------------------------------------------------------------------------
# Host-side helpers
# --------------------------------------------------------------------------------------
def _round_up(v, d):
    return ((v + d - 1) // d) * d


def _vmem_capacity_bytes():
    # TODO(synk): pltpu.get_tpu_info() may be unavailable on some jax builds; default to
    # the smallest per-core VMEM (v7x, 64 MiB) so the budget is always safe.
    try:
        return int(pltpu.get_tpu_info().vmem_capacity_bytes)
    except Exception:
        return 64 * 1024 * 1024


def _pick_tile_and_vmem(n_pad, m, c_in_pad, c_skip_pad, c_out):
    """Generation-aware M-tile size and scoped-VMEM limit."""
    chunk = 256
    m_ceil = _round_up(max(m, 1), chunk)
    cap = _vmem_capacity_bytes()
    if cap >= 100 * 1024 * 1024:          # v5e / v6e: 128 MiB physical VMEM
        budget, vmem_limit = 56 << 20, 96 << 20
    else:                                 # v7x: 64 MiB physical VMEM
        budget, vmem_limit = 16 << 20, 44 << 20
    resident = (8 * 4 + (c_in_pad + 1) * 2) * n_pad       # lane-dense source arrays
    knn_ws = 6 * n_pad * chunk * 4                        # per-chunk k-NN working set
    per_col = 2 * (8 * 4 + c_skip_pad * 2 + c_out * 4)    # double-buffered streamed tiles
    avail = budget - resident - knn_ws
    tile_m = chunk if avail < per_col * chunk else (avail // per_col) // chunk * chunk
    tile_m = int(max(chunk, min(tile_m, 2048)))
    if m_ceil > chunk:                    # keep >= 2 grid steps so both v7x cores get work
        tile_m = min(tile_m, max(chunk, _round_up(m_ceil // 2, chunk)))
    return min(tile_m, m_ceil), vmem_limit


def fp_module_forward(x, pos, batch, x_skip, pos_skip, batch_skip, params,
                      k=3, tile_m=None, num_batches=None):
    """Mirrors FPModule.forward:
    (nn(cat(knn_interpolate(x, pos, pos_skip, batch, batch_skip, k), x_skip)),
     pos_skip, batch_skip)."""
    w1, b1, w2, b2 = params
    n_src, c_in = x.shape
    m, c_skip = x_skip.shape
    hidden = w1.shape[1]
    c_out = w2.shape[1]
    assert w1.shape[0] == c_in + c_skip

    f32, bf16, i32 = jnp.float32, jnp.bfloat16, jnp.int32

    if num_batches is None:
        num_batches = int(jnp.maximum(jnp.max(batch), jnp.max(batch_skip))) + 1

    # Packing-aligned channel splits (keeps accT slicing and the in-kernel concat
    # relayout-free) and lane-aligned source count.
    c_in_pad = _round_up(c_in, 16)
    c_skip_pad = _round_up(c_skip, 16)
    c_cat = c_in_pad + c_skip_pad
    r_aug = _round_up(5 + num_batches, 8)
    n_pad = _round_up(n_src, 128)

    auto_tile, vmem_limit = _pick_tile_and_vmem(n_pad, m, c_in_pad, c_skip_pad, c_out)
    if tile_m is None:
        tile_m = auto_tile
    tile_m = _round_up(max(int(tile_m), 128), 128)
    chunk = 256 if tile_m % 256 == 0 else 128
    n_chunks = tile_m // chunk
    num_tiles = -(-m // tile_m)
    m_pad = num_tiles * tile_m

    # ---- source-side resident operands: lane dense, N on the 128-wide lane axis ----
    pos_s = pos.astype(f32)
    s_n2 = jnp.sum(pos_s * pos_s, axis=1)
    onehot_s = jax.nn.one_hot(batch.astype(i32), num_batches, dtype=f32)       # (N, B)
    src_aug = jnp.zeros((r_aug, n_pad), f32)
    src_aug = src_aug.at[0:3, :n_src].set(-2.0 * pos_s.T)
    src_aug = src_aug.at[3, :n_src].set(s_n2)
    src_aug = src_aug.at[3, n_src:].set(_FAR_PAD_SRC)       # padded sources never chosen
    src_aug = src_aug.at[4, :n_src].set(1.0)
    src_aug = src_aug.at[5:5 + num_batches, :n_src].set(_BIG_BATCH * onehot_s.T)

    x_augT = jnp.zeros((c_in_pad + 1, n_pad), f32)
    x_augT = x_augT.at[:c_in, :n_src].set(x.astype(f32).T)
    x_augT = x_augT.at[c_in_pad, :n_src].set(1.0)           # ones row -> weight sums
    x_augT = x_augT.astype(bf16)

    # ---- target-side streamed operands: M on the lane axis, padded to the grid ----
    pos_t = pos_skip.astype(f32)
    t_n2 = jnp.sum(pos_t * pos_t, axis=1)
    onehot_t = jax.nn.one_hot(batch_skip.astype(i32), num_batches, dtype=f32)  # (M, B)
    tgt_aug = jnp.zeros((r_aug, m_pad), f32)
    tgt_aug = tgt_aug.at[0:3, :m].set(pos_t.T)
    tgt_aug = tgt_aug.at[3, :m].set(1.0)
    tgt_aug = tgt_aug.at[4, :m].set(t_n2)
    tgt_aug = tgt_aug.at[5:5 + num_batches, :m].set((1.0 - onehot_t).T)

    x_skipT = jnp.zeros((c_skip_pad, m_pad), f32)
    x_skipT = x_skipT.at[:c_skip, :m].set(x_skip.astype(f32).T)
    x_skipT = x_skipT.astype(bf16)

    # ---- MLP weights, repacked for the padded concat layout ----
    w1_pad = jnp.zeros((c_cat, hidden), f32)
    w1_pad = w1_pad.at[:c_in].set(w1.astype(f32)[:c_in])
    w1_pad = w1_pad.at[c_in_pad:c_in_pad + c_skip].set(w1.astype(f32)[c_in:])
    w1T = w1_pad.T.astype(bf16)                              # (H, C_cat)
    b1T = b1.astype(f32).reshape(hidden, 1)                  # (H, 1)
    w2T = w2.astype(f32).T.astype(bf16)                      # (C_out, H)
    b2T = b2.astype(f32).reshape(c_out, 1)                   # (C_out, 1)

    kernel = functools.partial(fp_kernel, k=k, c_in_pad=c_in_pad,
                               chunk=chunk, n_chunks=n_chunks)

    # TODO(synk): mark the constant-index resident blocks pipeline_mode=pl.Buffered(1)
    # (single-buffered) once uniformly supported; their block index never changes.
    def resident(shape):
        return pl.BlockSpec(shape, lambda i: (0, 0))

    def tiled(rows):
        return pl.BlockSpec((rows, tile_m), lambda i: (0, i))

    out_T = pl.pallas_call(
        kernel,
        out_shape=jax.ShapeDtypeStruct((c_out, m_pad), f32),
        grid_spec=pltpu.PrefetchScalarGridSpec(
            num_scalar_prefetch=0,
            grid=(num_tiles,),
            in_specs=[
                resident((r_aug, n_pad)),          # augmented source positions
                resident((c_in_pad + 1, n_pad)),   # source features + ones row (bf16)
                tiled(r_aug),                      # augmented target positions
                tiled(c_skip_pad),                 # skip features (bf16)
                resident((hidden, c_cat)),         # W1^T (concat layout)
                resident((hidden, 1)),             # b1
                resident((c_out, hidden)),         # W2^T
                resident((c_out, 1)),              # b2
            ],
            out_specs=tiled(c_out),
        ),
        compiler_params=pltpu.CompilerParams(
            dimension_semantics=("parallel",),
            vmem_limit_bytes=int(vmem_limit),
        ),
    )(src_aug, x_augT, tgt_aug, x_skipT, w1T, b1T, w2T, b2T)

    out = jnp.transpose(out_T[:, :m])                        # (M, C_out)
    return out, pos_skip, batch_skip


def _fp_reference(x, pos, batch, x_skip, pos_skip, batch_skip, params, k=3):
    """Pure-JAX f32 reference of FPModule.forward (Linear->ReLU->Linear head)."""
    w1, b1, w2, b2 = params
    d2 = jnp.sum((pos_skip[:, None, :] - pos[None, :, :]) ** 2, axis=-1)   # (M, N)
    d2 = jnp.where(batch_skip[:, None] == batch[None, :], d2, jnp.inf)
    neg_top, idx = lax.top_k(-d2, k)                                       # (M, k)
    w = 1.0 / jnp.maximum(-neg_top, 1e-16)
    y = jnp.sum(x[idx] * w[..., None], axis=1) / jnp.sum(w, axis=1, keepdims=True)
    h = jnp.maximum(jnp.concatenate([y, x_skip], axis=1) @ w1 + b1, 0.0)
    return h @ w2 + b2


if __name__ == "__main__":
    # Small shapes consistent with the module: 2 batch elements, coarse -> fine propagation.
    B = 2
    N_SRC = 64        # coarse points (x, pos)          -- 32 per batch element
    N_SKIP = 256      # fine points (x_skip, pos_skip)  -- 128 per batch element
    C_IN = 16
    C_SKIP = 16
    HIDDEN = 32
    C_OUT = 32
    K = 3

    key = jax.random.PRNGKey(0)
    k1, k2, k3, k4, k5, k6, k7, k8 = jax.random.split(key, 8)

    x = jax.random.normal(k1, (N_SRC, C_IN), jnp.float32)
    pos = jax.random.normal(k2, (N_SRC, 3), jnp.float32)
    x_skip = jax.random.normal(k3, (N_SKIP, C_SKIP), jnp.float32)
    pos_skip = jax.random.normal(k4, (N_SKIP, 3), jnp.float32)

    batch = jnp.concatenate([jnp.zeros((N_SRC // B,), jnp.int32),
                             jnp.ones((N_SRC // B,), jnp.int32)])
    batch_skip = jnp.concatenate([jnp.zeros((N_SKIP // B,), jnp.int32),
                                  jnp.ones((N_SKIP // B,), jnp.int32)])

    # The module's `nn`: MLP([C_IN + C_SKIP, HIDDEN, C_OUT]) modeled as Lin -> ReLU -> Lin.
    w1 = jax.random.normal(k5, (C_IN + C_SKIP, HIDDEN), jnp.float32) * 0.1
    b1 = jax.random.normal(k6, (1, HIDDEN), jnp.float32) * 0.01
    w2 = jax.random.normal(k7, (HIDDEN, C_OUT), jnp.float32) * 0.1
    b2 = jax.random.normal(k8, (1, C_OUT), jnp.float32) * 0.01

    out, pos_out, batch_out = fp_module_forward(
        x, pos, batch, x_skip, pos_skip, batch_skip, (w1, b1, w2, b2),
        k=K, tile_m=128)      # tile_m=128 -> grid=(2,) exercises the M tiling
    out = jax.block_until_ready(out)

    assert out.shape == (N_SKIP, C_OUT)
    assert bool(jnp.all(jnp.isfinite(out)))

    # Loose correctness check vs a pure-JAX f32 reference (kernel uses bf16 matmuls and
    # approx reciprocals; near-tied neighbours may resolve differently).
    ref = _fp_reference(x, pos, batch, x_skip, pos_skip, batch_skip,
                        (w1, b1, w2, b2), k=K)
    scale = float(jnp.mean(jnp.abs(ref))) + 1e-6
    abs_err = jnp.abs(out - ref)
    assert float(jnp.mean(abs_err)) <= 0.15 * scale
    assert float(jnp.mean((abs_err > 0.25 * scale).astype(jnp.float32))) <= 0.10

    print("KERNEL_OK")
</pallas_src>

<mosaic_0001>
module attributes {stable_mosaic.version = 11 : i64} {
  func.func @fp_kernel(%arg0: i32, %arg1: memref<8x128xf32, #tpu.memory_space<vmem>>, %arg2: memref<17x128xbf16, #tpu.memory_space<vmem>>, %arg3: memref<8x128xf32, #tpu.memory_space<vmem>>, %arg4: memref<16x128xbf16, #tpu.memory_space<vmem>>, %arg5: memref<32x32xbf16, #tpu.memory_space<vmem>>, %arg6: memref<32x1xf32, #tpu.memory_space<vmem>>, %arg7: memref<32x32xbf16, #tpu.memory_space<vmem>>, %arg8: memref<32x1xf32, #tpu.memory_space<vmem>>, %arg9: memref<32x128xf32, #tpu.memory_space<vmem>>) attributes {dimension_semantics = [#tpu.dimension_semantics<parallel>], iteration_bounds = array<i64: 2>, scalar_prefetch = 0 : i64, scratch_operands = 0 : i64, tpu.core_type = #tpu.core_type<tc>, window_params = [{pipeline_mode = #tpu.pipeline_mode<synchronous>, transform_indices = @transform_0, window_bounds = array<i64: 8, 128>}, {pipeline_mode = #tpu.pipeline_mode<synchronous>, transform_indices = @transform_1, window_bounds = array<i64: 17, 128>}, {transform_indices = @transform_2, window_bounds = array<i64: 8, 128>}, {transform_indices = @transform_3, window_bounds = array<i64: 16, 128>}, {pipeline_mode = #tpu.pipeline_mode<synchronous>, transform_indices = @transform_4, window_bounds = array<i64: 32, 32>}, {pipeline_mode = #tpu.pipeline_mode<synchronous>, transform_indices = @transform_5, window_bounds = array<i64: 32, 1>}, {pipeline_mode = #tpu.pipeline_mode<synchronous>, transform_indices = @transform_6, window_bounds = array<i64: 32, 32>}, {pipeline_mode = #tpu.pipeline_mode<synchronous>, transform_indices = @transform_7, window_bounds = array<i64: 32, 1>}, {transform_indices = @transform_8, window_bounds = array<i64: 32, 128>}]} {
    %c0 = arith.constant 0 : index
    %c0_0 = arith.constant 0 : index
    %0 = vector.load %arg1[%c0, %c0_0] : memref<8x128xf32, #tpu.memory_space<vmem>>, vector<8x128xf32>
    %1 = tpu.transpose %0, [1, 0] : vector<8x128xf32> -> vector<128x8xf32>
    %c0_1 = arith.constant 0 : index
    %c0_2 = arith.constant 0 : index
    %2 = vector.load %arg2[%c0_1, %c0_2] : memref<17x128xbf16, #tpu.memory_space<vmem>>, vector<17x128xbf16>
    %c0_3 = arith.constant 0 : index
    %c0_4 = arith.constant 0 : index
    %3 = vector.load %arg5[%c0_3, %c0_4] : memref<32x32xbf16, #tpu.memory_space<vmem>>, vector<32x32xbf16>
    %c0_5 = arith.constant 0 : index
    %c0_6 = arith.constant 0 : index
    %4 = vector.load %arg7[%c0_5, %c0_6] : memref<32x32xbf16, #tpu.memory_space<vmem>>, vector<32x32xbf16>
    %c0_7 = arith.constant 0 : index
    %c0_8 = arith.constant 0 : index
    %5 = vector.load %arg6[%c0_7, %c0_8] : memref<32x1xf32, #tpu.memory_space<vmem>>, vector<32x1xf32>
    %c0_9 = arith.constant 0 : index
    %c0_10 = arith.constant 0 : index
    %6 = vector.load %arg8[%c0_9, %c0_10] : memref<32x1xf32, #tpu.memory_space<vmem>>, vector<32x1xf32>
    %c0_i32 = arith.constant 0 : i32
    %c128_i32 = arith.constant 128 : i32
    %7 = arith.muli %c0_i32, %c128_i32 : i32
    %8 = tpu.assume_multiple %7, 128 : i32
    %c0_11 = arith.constant 0 : index
    %9 = arith.index_cast %8 : i32 to index
    %10 = vector.load %arg3[%c0_11, %9] : memref<8x128xf32, #tpu.memory_space<vmem>>, vector<8x128xf32>
    %cst = arith.constant dense<0.000000e+00> : vector<128x128xf32>
    %11 = tpu.matmul %1, %10, %cst {dimension_numbers = #tpu.dot_dimension_numbers<[1], [0], [0], [1], [0, 0, 1, 1], [], []>} : vector<128x8xf32>, vector<8x128xf32>, vector<128x128xf32> -> vector<128x128xf32>
    %cst_12 = arith.constant 0.000000e+00 : f32
    %12 = vector.broadcast %cst_12 : f32 to vector<128x128xf32>
    %13 = arith.maximumf %11, %12 : vector<128x128xf32>
    %cst_13 = arith.constant 0.000000e+00 : f32
    %14 = vector.broadcast %cst_13 : f32 to vector<128x128xf32>
    %cst_14 = arith.constant dense<0x7F800000> : vector<128xf32>
    %15 = vector.multi_reduction <minimumf>, %13, %cst_14 [0] : vector<128x128xf32> to vector<128xf32>
    %16 = vector.shape_cast %15 : vector<128xf32> to vector<1x128xf32>
    %17 = vector.broadcast %16 : vector<1x128xf32> to vector<128x128xf32>
    %18 = arith.cmpf ole, %13, %17 : vector<128x128xf32>
    %cst_15 = arith.constant 1.000000e-16 : f32
    %19 = vector.broadcast %cst_15 : f32 to vector<1x128xf32>
    %20 = arith.maximumf %16, %19 : vector<1x128xf32>
    %21 = tpu.reciprocal %20 {approx = true} : vector<1x128xf32> -> vector<1x128xf32>
    %cst_16 = arith.constant 0.000000e+00 : f32
    %22 = vector.shape_cast %21 : vector<1x128xf32> to vector<1x128xf32>
    %23 = vector.broadcast %22 : vector<1x128xf32> to vector<128x128xf32>
    %24 = vector.broadcast %cst_16 : f32 to vector<128x128xf32>
    %25 = arith.select %18, %23, %24 : vector<128x128xi1>, vector<128x128xf32>
    %26 = arith.addf %14, %25 : vector<128x128xf32>
    %cst_17 = arith.constant 1.000000e+30 : f32
    %27 = vector.broadcast %cst_17 : f32 to vector<128x128xf32>
    %28 = arith.select %18, %27, %13 : vector<128x128xi1>, vector<128x128xf32>
    %cst_18 = arith.constant dense<0x7F800000> : vector<128xf32>
    %29 = vector.multi_reduction <minimumf>, %28, %cst_18 [0] : vector<128x128xf32> to vector<128xf32>
    %30 = vector.shape_cast %29 : vector<128xf32> to vector<1x128xf32>
    %31 = vector.broadcast %30 : vector<1x128xf32> to vector<128x128xf32>
    %32 = arith.cmpf ole, %28, %31 : vector<128x128xf32>
    %cst_19 = arith.constant 1.000000e-16 : f32
    %33 = vector.broadcast %cst_19 : f32 to vector<1x128xf32>
    %34 = arith.maximumf %30, %33 : vector<1x128xf32>
    %35 = tpu.reciprocal %34 {approx = true} : vector<1x128xf32> -> vector<1x128xf32>
    %cst_20 = arith.constant 0.000000e+00 : f32
    %36 = vector.shape_cast %35 : vector<1x128xf32> to vector<1x128xf32>
    %37 = vector.broadcast %36 : vector<1x128xf32> to vector<128x128xf32>
    %38 = vector.broadcast %cst_20 : f32 to vector<128x128xf32>
    %39 = arith.select %32, %37, %38 : vector<128x128xi1>, vector<128x128xf32>
    %40 = arith.addf %26, %39 : vector<128x128xf32>
    %cst_21 = arith.constant 1.000000e+30 : f32
    %41 = vector.broadcast %cst_21 : f32 to vector<128x128xf32>
    %42 = arith.select %32, %41, %28 : vector<128x128xi1>, vector<128x128xf32>
    %cst_22 = arith.constant dense<0x7F800000> : vector<128xf32>
    %43 = vector.multi_reduction <minimumf>, %42, %cst_22 [0] : vector<128x128xf32> to vector<128xf32>
    %44 = vector.shape_cast %43 : vector<128xf32> to vector<1x128xf32>
    %45 = vector.broadcast %44 : vector<1x128xf32> to vector<128x128xf32>
    %46 = arith.cmpf ole, %42, %45 : vector<128x128xf32>
    %cst_23 = arith.constant 1.000000e-16 : f32
    %47 = vector.broadcast %cst_23 : f32 to vector<1x128xf32>
    %48 = arith.maximumf %44, %47 : vector<1x128xf32>
    %49 = tpu.reciprocal %48 {approx = true} : vector<1x128xf32> -> vector<1x128xf32>
    %cst_24 = arith.constant 0.000000e+00 : f32
    %50 = vector.shape_cast %49 : vector<1x128xf32> to vector<1x128xf32>
    %51 = vector.broadcast %50 : vector<1x128xf32> to vector<128x128xf32>
    %52 = vector.broadcast %cst_24 : f32 to vector<128x128xf32>
    %53 = arith.select %46, %51, %52 : vector<128x128xi1>, vector<128x128xf32>
    %54 = arith.addf %40, %53 : vector<128x128xf32>
    %55 = arith.truncf %54 : vector<128x128xf32> to vector<128x128xbf16>
    %cst_25 = arith.constant dense<0.000000e+00> : vector<17x128xf32>
    %56 = tpu.matmul %2, %55, %cst_25 {dimension_numbers = #tpu.dot_dimension_numbers<[1], [0], [0], [1], [0, 0, 1, 1], [], []>} : vector<17x128xbf16>, vector<128x128xbf16>, vector<17x128xf32> -> vector<17x128xf32>
    %57 = vector.extract_strided_slice %56 {offsets = [0, 0], sizes = [16, 128], strides = [1, 1]} : vector<17x128xf32> to vector<16x128xf32>
    %58 = vector.extract_strided_slice %56 {offsets = [16, 0], sizes = [1, 128], strides = [1, 1]} : vector<17x128xf32> to vector<1x128xf32>
    %59 = tpu.reciprocal %58 {approx = true} : vector<1x128xf32> -> vector<1x128xf32>
    %60 = vector.broadcast %59 : vector<1x128xf32> to vector<16x128xf32>
    %61 = arith.mulf %57, %60 : vector<16x128xf32>
    %62 = arith.truncf %61 : vector<16x128xf32> to vector<16x128xbf16>
    %c0_26 = arith.constant 0 : index
    %63 = arith.index_cast %8 : i32 to index
    %64 = vector.load %arg4[%c0_26, %63] : memref<16x128xbf16, #tpu.memory_space<vmem>>, vector<16x128xbf16>
    %65 = tpu.concatenate %62, %64 in 0 : vector<16x128xbf16>, vector<16x128xbf16> -> vector<32x128xbf16>
    %cst_27 = arith.constant dense<0.000000e+00> : vector<32x128xf32>
    %66 = tpu.matmul %3, %65, %cst_27 {dimension_numbers = #tpu.dot_dimension_numbers<[1], [0], [0], [1], [0, 0, 1, 1], [], []>} : vector<32x32xbf16>, vector<32x128xbf16>, vector<32x128xf32> -> vector<32x128xf32>
    %67 = vector.broadcast %5 : vector<32x1xf32> to vector<32x128xf32>
    %68 = arith.addf %66, %67 : vector<32x128xf32>
    %cst_28 = arith.constant 0.000000e+00 : f32
    %69 = vector.broadcast %cst_28 : f32 to vector<32x128xf32>
    %70 = arith.maximumf %68, %69 : vector<32x128xf32>
    %71 = arith.truncf %70 : vector<32x128xf32> to vector<32x128xbf16>
    %cst_29 = arith.constant dense<0.000000e+00> : vector<32x128xf32>
    %72 = tpu.matmul %4, %71, %cst_29 {dimension_numbers = #tpu.dot_dimension_numbers<[1], [0], [0], [1], [0, 0, 1, 1], [], []>} : vector<32x32xbf16>, vector<32x128xbf16>, vector<32x128xf32> -> vector<32x128xf32>
    %73 = vector.broadcast %6 : vector<32x1xf32> to vector<32x128xf32>
    %74 = arith.addf %72, %73 : vector<32x128xf32>
    %c0_30 = arith.constant 0 : index
    %75 = arith.index_cast %8 : i32 to index
    %76 = vector.load %arg9[%c0_30, %75] : memref<32x128xf32, #tpu.memory_space<vmem>>, vector<32x128xf32>
    tpu.vector_store %arg9[%c0_30, %75], %74 {strides = array<i32>} : memref<32x128xf32, #tpu.memory_space<vmem>>, vector<32x128xf32>,
    %c1_i32 = arith.constant 1 : i32
    return
  }
  func.func @transform_0(%arg0: i32) -> (i32, i32) {
    %c0_i32 = arith.constant 0 : i32
    %c0_i32_0 = arith.constant 0 : i32
    %c0_i32_1 = arith.constant 0 : i32
    return %c0_i32, %c0_i32_0 : i32, i32
  }
  func.func @transform_1(%arg0: i32) -> (i32, i32) {
    %c0_i32 = arith.constant 0 : i32
    %c0_i32_0 = arith.constant 0 : i32
    %c0_i32_1 = arith.constant 0 : i32
    return %c0_i32, %c0_i32_0 : i32, i32
  }
  func.func @transform_2(%arg0: i32) -> (i32, i32) {
    %c0_i32 = arith.constant 0 : i32
    %c0_i32_0 = arith.constant 0 : i32
    return %c0_i32, %arg0 : i32, i32
  }
  func.func @transform_3(%arg0: i32) -> (i32, i32) {
    %c0_i32 = arith.constant 0 : i32
    %c0_i32_0 = arith.constant 0 : i32
    return %c0_i32, %arg0 : i32, i32
  }
  func.func @transform_4(%arg0: i32) -> (i32, i32) {
    %c0_i32 = arith.constant 0 : i32
    %c0_i32_0 = arith.constant 0 : i32
    %c0_i32_1 = arith.constant 0 : i32
    return %c0_i32, %c0_i32_0 : i32, i32
  }
  func.func @transform_5(%arg0: i32) -> (i32, i32) {
    %c0_i32 = arith.constant 0 : i32
    %c0_i32_0 = arith.constant 0 : i32
    %c0_i32_1 = arith.constant 0 : i32
    return %c0_i32, %c0_i32_0 : i32, i32
  }
  func.func @transform_6(%arg0: i32) -> (i32, i32) {
    %c0_i32 = arith.constant 0 : i32
    %c0_i32_0 = arith.constant 0 : i32
    %c0_i32_1 = arith.constant 0 : i32
    return %c0_i32, %c0_i32_0 : i32, i32
  }
  func.func @transform_7(%arg0: i32) -> (i32, i32) {
    %c0_i32 = arith.constant 0 : i32
    %c0_i32_0 = arith.constant 0 : i32
    %c0_i32_1 = arith.constant 0 : i32
    return %c0_i32, %c0_i32_0 : i32, i32
  }
  func.func @transform_8(%arg0: i32) -> (i32, i32) {
    %c0_i32 = arith.constant 0 : i32
    %c0_i32_0 = arith.constant 0 : i32
    return %c0_i32, %arg0 : i32, i32
  }
}

</mosaic_0001>

<bundles_post_ra>
// kernel: tpu_custom_call.1
= control target key start
LH: loop header
LB: loop body
LE: loop exit
PB: predicated region body
PF: predicated region fallthrough
CT: control target
= control target key end

     0   :  { %13 = vsyncpa [#allocation3], 0  ;;  %s2163_s0 = inlined_call_operand.hbm [shape: f32[8,128], index: 0, kind: input, shape index: {}]   ;;  %s2164_s1 = inlined_call_operand.hbm [shape: bf16[17,128], index: 1, kind: input, shape index: {}]   ;;  %s2165_s2 = inlined_call_operand.vmem [shape: f32[8,256], index: 2, kind: input, shape index: {}]   ;;  %s2166_s3 = inlined_call_operand.vmem [shape: bf16[16,256], index: 3, kind: input, shape index: {}]   ;;  %s2167_s4 = inlined_call_operand.vmem [shape: bf16[32,32], index: 4, kind: input, shape index: {}]   ;;  %s2168_s5 = inlined_call_operand.vmem [shape: f32[32,1], index: 5, kind: input, shape index: {}]   ;;  %s2169_s6 = inlined_call_operand.vmem [shape: bf16[32,32], index: 6, kind: input, shape index: {}]   ;;  %s2170_s7 = inlined_call_operand.vmem [shape: f32[32,1], index: 7, kind: input, shape index: {}]   ;;  %s2171_s8 = inlined_call_operand.hbm [shape: f32[32,256], index: 8, kind: output, shape index: {}]  }
   0x1   :  { %14 = vsyncpa [#allocation6], 0 }
   0x2   :  { %15 = vsyncpa [#allocation4], 0 }
   0x3   :  { %17 = vsyncpa [#allocation4 + $0x1], 0  ;;  %s1455_s27 = smov 0   ;;  %s1457_s28 = smov 0  }
   0x4   :  { %s1459_s29 = smov 0   ;;  %s1461_s30 = smov 0  }
   0x5 LB: > { %s1476_s9 = sadd.s32 4294967295, %s1400_s30   ;;  %s1123_s10 = sadd.s32 4294967294, %s1400_s30   ;;  %s1400_s30 = sphi %s1461_s30, %s2227_s30   ;;  %s1396_s29 = sphi %s1459_s29, %s2226_s29   ;;  %s1392_s28 = sphi %s1457_s28, %s2225_s28   ;;  %s1388_s27 = sphi %s1455_s27, %s2224_s27  }
   0x6   : > { %s1480_s11 = sadd.s32 1, %s1400_s30   ;;  %s98_s12 = sadd.s32 1, %s1396_s29 }
   0x7   : > { %s95_s13 = ssub.s32 %s1400_s30, %s1480_s11  ;;  %p105_p0 = scmp.ne.s32.totalorder %s1396_s29, %s1392_s28 }
   0x8   : > { %p96_p1 = scmp.eq.s32.totalorder %s95_s13, 0  ;;  %p106_p2 = scmp.eq.s32.totalorder %s1400_s30, 0 }
   0x9   : > { %p219_p3 = scmp.eq.s32.totalorder %s1476_s9, 1  ;;  %p224_p4 = scmp.ne.s32.totalorder %s1392_s28, %s1388_s27 }
   0xa   : > { %s1492_s14 = scalar_select %p96_p1, %s1396_s29, %s98_s12  }
   0xb   : > { %p1494_p5 = por %p106_p2, %p105_p0  ;;  %p1498_p6 = por %p219_p3, %p105_p0 }
   0xc   : > { %p225_p7 = scmp.eq.s32.totalorder %s1123_s10, 1  ;;  %p1124_p8 = scmp.ge.s32.totalorder %s1400_s30, 1 }
   0xd   : > { %p232_p9 = scmp.lt.s32.totalorder %s1400_s30, 3  ;;  %p1213_p11 = scmp.eq.s32.totalorder %s1476_s9, 0 }
   0xe   : > { %p1504_p10 = por %p225_p7, %p224_p4  ;;  %s244_s21 = sshll.u32 %s2163_s0, 4  ;;  %s245_s21 = int_to_ptr.hbm [resolvable:$true] %s244_s21 }
   0xf   : > { %p1509_p12 = pnand %p1124_p8, %p232_p9  ;;  %s1402_s22 = smov [#allocation2]  }
  0x10   : > { %s246_s23 = sshll.u32 %s1402_s22, 4  ;;  %s255_s26 = sshll.u32 %s2164_s1, 4  ;;  %s247_s23 = int_to_ptr.vmem [resolvable:$true] %s246_s23  ;;  %s256_s26 = int_to_ptr.hbm [resolvable:$true] %s255_s26 }
  0x11   : > { %p1202_p13 = pneg %p1509_p12  ;;  %s1403_s10 = smov [#allocation5]  }
  0x12   : > { %s257_s12 = sshll.u32 %s1403_s10, 4  ;;  %s1404_s13 = smov 64   ;;  %s258_s12 = int_to_ptr.vmem [resolvable:$true] %s257_s12 }
  0x13   : > { %p1203_p0 = pnand %p1213_p11, %p1202_p13  ;;  %s1405_s19 = smov 4  }
  0x14   : > { %p1127_p1 = scmp.ge.s32.totalorder %s1400_s30, 2 }
  0x15   : > { %1205 = dma.hbm_to_vmem [thread:$0]  (!%p1203_p0), %s245_s21, 128, %s247_s23, [#allocation3]  }
  0x16   : > { %1208 = dma.hbm_to_vmem [thread:$0]  (!%p1203_p0), %s256_s26, 192, %s258_s12, [#allocation6], %s1404_s13, %s1404_s13, %s1405_s19  }
  0x17   : > { %279 = sbr.rel (%p1127_p1) target bundleno = 34 (0x22), region = 40 }
  0x1c   : > { %289 = sbr.rel (!%p1494_p5) target bundleno = 34 (0x22), region = 48  ;;  %s291_s20 = sand.u32 (%p1494_p5), 1, %s1396_s29  }
  0x1d   : > { %s1129_s22 = sshll.u32 (%p1494_p5), %s1400_s30, 2  ;;  %s1128_s24 = sshll.u32 (%p1494_p5), %s291_s20, 3 }
  0x1e   : > { %s295_s21 = scalar_lea.vmem (%p1494_p5), %s2166_s3, %s1129_s22  ;;  %s293_s23 = scalar_lea.vmem (%p1494_p5), [#allocation7], %s1128_s24 }
  0x1f   : > { %v312_v0 = vld [vmem:[%s295_s21] sm:$0xf] (%p1494_p5)  ;;  %v314_v1 = vld [vmem:[%s295_s21 + $0x8] sm:$0xf] (%p1494_p5) }
  0x20   : > { %313 = vst [vmem:[%s293_s23] sm:$0xf] (%p1494_p5), %v312_v0 }
  0x21   : > { %315 = vst [vmem:[%s293_s23 + $0x4] sm:$0xf] %v314_v1 }
  0x22 PF: > { %346 = sbr.rel (%p1509_p12) target bundleno = 1077 (0x435), region = 89 }
  0x27   : > { %1375 = dma.done.wait (%p1213_p11), [#allocation3], 128  }
  0x28   : > { %1377 = vsyncadd (%p1213_p11), [#allocation3], 4294967168 }
  0x29   : > { %1379 = dma.done.wait (%p1213_p11), [#allocation6], 192  }
  0x2a   : > { %1381 = vsyncadd (%p1213_p11), [#allocation6], 4294967104  ;;  %p396_p2 = scmp.lt.s32.totalorder %s1476_s9, 1  ;;  %v401_v2 = vld [vmem:[#allocation2] sm:$0xff]  ;;  %vm454_vm0 = vcmask 64512   ;;  %s2086_s19 = sand.u32 1, %s1392_s28  }
  0x2b   : > { %402 = vxpose.xlu0.b32.start.end [1/1] (short) %v401_v2, 128  ;;  %s1133_s20 = sshll.u32 %s2086_s19, 3  ;;  %s1134_s24 = sshll.u32 %s2086_s19, 5 }
  0x2c   : > { %s397_s15 = scalar_select %p396_p2, %s1476_s9, 1 }
  0x2d   : > { %s361_s22 = scalar_lea.vmem [#allocation7], %s1133_s20  ;;  %s395_s25 = scalar_lea.vmem [#allocation8], %s1134_s24 }
  0x2e   : > { %s1135_s26 = sshll.u32 %s397_s15, 3  ;;  %s1181_s10 = sshll.u32 %s1476_s9, 3 }
  0x2f   : > { %s399_s13 = scalar_lea.vmem %s2165_s2, %s1135_s26  ;;  %s1017_s15 = scalar_lea.hbm %s2171_s8, %s1181_s10 }
  0x30   : > { %v453_v3 = vld [vmem:[%s399_s13] sm:$0xff]  ;;  %s1018_s26 = sshll.u32 %s395_s25, 4  ;;  %s1020_s12 = sshll.u32 %s1017_s15, 4  ;;  %s1019_s26 = int_to_ptr.vmem [resolvable:$true] %s1018_s26  ;;  %s1021_s12 = int_to_ptr.hbm [resolvable:$true] %s1020_s12 }
  0x31   : > { %518 = vmatpush.msra.mxu0 %v453_v3  ;;  %1190 = vmatpush.msra.mxu2 %v453_v3  ;;  %s1007_s18 = scalar_lea.sflag [#allocation4], %s2086_s19  ;;  %s1344_s13 = sshra.s32 %s1021_s12, 4  ;;  %s1345_s13 = int_to_ptr.hbm [resolvable:$true] %s1344_s13 }
  0x32   : > { %1191 = vmatpush.msra.mxu3 %v453_v3  ;;  %s1346_s20 = scalar_lea.hbm %s1345_s13, 32  ;;  %s1350_s24 = scalar_lea.hbm %s2171_s8, 64 }
  0x33   : > { %p1347_p3 = scmp.ne.s32.totalorder %s1345_s13, %s1346_s20  ;;  %p1351_p7 = scmp.lt.s32.totalorder %s1345_s13, %s2171_s8 }
  0x34   : > { %p1352_p8 = scmp.lt.s32.totalorder %s1350_s24, %s1346_s20 }
  0x35   : > { %p1348_p4 = pnand %p1347_p3, %p1498_p6 }
  0x36   : > { %p1353_p9 = por %p1352_p8, %p1351_p7 }
  0x37   : > { %p1349_p5 = pneg %p1348_p4 }
  0x39   : > { %p1354_p11 = pnand %p1353_p9, %p1349_p5 }
  0xcf   : > { %v418_v4 = vpop.trf.xlu0 }
  0xd0   : > { %1136 = vmatmul.msk.f32.vlgmr.msra.gmra.mxu0 %vm454_vm0, %v418_v4 }
  0xd7   : > { %v419_v5 = vpop.trf.xlu0 }
  0xd8   : > { %1137 = vmatmul.msk.f32.gmra.mxu0 %vm454_vm0, %v419_v5 }
  0xdf   : > { %v420_v6 = vpop.trf.xlu0 }
  0xe0   : > { %1138 = vmatmul.msk.f32.gmra.mxu0 %vm454_vm0, %v420_v6 }
  0xe7   : > { %v421_v7 = vpop.trf.xlu0 }
  0xe8   : > { %1139 = vmatmul.msk.f32.gmra.mxu0 %vm454_vm0, %v421_v7 }
  0xef   : > { %v422_v8 = vpop.trf.xlu0 }
  0xf0   : > { %1140 = vmatmul.msk.f32.gmra.mxu0 %vm454_vm0, %v422_v8 }
  0xf7   : > { %v423_v9 = vpop.trf.xlu0 }
  0xf8   : > { %1141 = vmatmul.msk.f32.gmra.mxu0 %vm454_vm0, %v423_v9 }
  0xff   : > { %v424_v10 = vpop.trf.xlu0 }
 0x100   : > { %1142 = vmatmul.msk.f32.gmra.mxu0 %vm454_vm0, %v424_v10 }
 0x107   : > { %v425_v11 = vpop.trf.xlu0 }
 0x108   : > { %1143 = vmatmul.msk.f32.gmra.mxu0 %vm454_vm0, %v425_v11 }
 0x10f   : > { %v426_v12 = vpop.trf.xlu0 }
 0x110   : > { %1144 = vmatmul.msk.f32.vlgmr.msra.gmra.mxu2 %vm454_vm0, %v426_v12 }
 0x117   : > { %v427_v13 = vpop.trf.xlu0 }
 0x118   : > { %1145 = vmatmul.msk.f32.gmra.mxu2 %vm454_vm0, %v427_v13 }
 0x11f   : > { %v428_v14 = vpop.trf.xlu0 }
 0x120   : > { %1146 = vmatmul.msk.f32.gmra.mxu2 %vm454_vm0, %v428_v14 }
 0x127   : > { %v429_v15 = vpop.trf.xlu0 }
 0x128   : > { %1147 = vmatmul.msk.f32.gmra.mxu2 %vm454_vm0, %v429_v15 }
 0x12f   : > { %v430_v16 = vpop.trf.xlu0 }
 0x130   : > { %1148 = vmatmul.msk.f32.vlgmr.msra.gmra.mxu3 %vm454_vm0, %v430_v16 }
 0x137   : > { %v431_v17 = vpop.trf.xlu0 }
 0x138   : > { %1149 = vmatmul.msk.f32.gmra.mxu3 %vm454_vm0, %v431_v17 }
 0x13f   : > { %v432_v18 = vpop.trf.xlu0 }
 0x140   : > { %1150 = vmatmul.msk.f32.gmra.mxu3 %vm454_vm0, %v432_v18 }
 0x147   : > { %v433_v19 = vpop.trf.xlu0 }
 0x148   : > { %1151 = vmatmul.msk.f32.gmra.mxu3 %vm454_vm0, %v433_v19 }
 0x14d   : > { %v520_v20 = vpop.f32.mrf.mxu0 }
 0x14e   : > { %v1576_v41 = vmax.f32 %v520_v20, 0.0 }
 0x155   : > { %v523_v21 = vpop.f32.mrf.mxu0 }
 0x156   : > { %v1570_v38 = vmax.f32 %v523_v21, 0.0 }
 0x15d   : > { %v526_v22 = vpop.f32.mrf.mxu0 }
 0x15e   : > { %v1578_v42 = vmax.f32 %v526_v22, 0.0 }
 0x165   : > { %v529_v23 = vpop.f32.mrf.mxu0 }
 0x166   : > { %v1580_v43 = vmax.f32 %v529_v23, 0.0 }
 0x16d   : > { %v532_v24 = vpop.f32.mrf.mxu0 }
 0x16e   : > { %v1566_v35 = vmax.f32 %v532_v24, 0.0 }
 0x170   : > { %v584_v49 = vmin.f32 %v1576_v41, %v1566_v35 }
 0x175   : > { %v535_v26 = vpop.f32.mrf.mxu0 }
 0x176   : > { %v1564_v34 = vmax.f32 %v535_v26, 0.0 }
 0x178   : > { %v585_v45 = vmin.f32 %v1570_v38, %v1564_v34 }
 0x17d   : > { %v538_v29 = vpop.f32.mrf.mxu0 }
 0x17e   : > { %v1568_v36 = vmax.f32 %v538_v29, 0.0 }
 0x180   : > { %v586_v50 = vmin.f32 %v1578_v42, %v1568_v36 }
 0x185   : > { %v541_v32 = vpop.f32.mrf.mxu0 }
 0x186   : > { %v1572_v39 = vmax.f32 %v541_v32, 0.0 }
 0x188   : > { %v587_v51 = vmin.f32 %v1580_v43, %v1572_v39 }
 0x193   : > { %v544_v25 = vpop.f32.mrf.mxu2 }
 0x194   : > { %v1582_v44 = vmax.f32 %v544_v25, 0.0 }
 0x196   : > { %v588_v55 = vmin.f32 %v584_v49, %v1582_v44 }
 0x19b   : > { %v547_v27 = vpop.f32.mrf.mxu2 }
 0x19c   : > { %v1574_v40 = vmax.f32 %v547_v27, 0.0 }
 0x19e   : > { %v589_v52 = vmin.f32 %v585_v45, %v1574_v40 }
 0x1a3   : > { %v550_v30 = vpop.f32.mrf.mxu2 }
 0x1a4   : > { %v1586_v46 = vmax.f32 %v550_v30, 0.0 }
 0x1a6   : > { %v590_v57 = vmin.f32 %v586_v50, %v1586_v46 }
 0x1ab   : > { %v553_v37 = vpop.f32.mrf.mxu2 }
 0x1ac   : > { %v1588_v47 = vmax.f32 %v553_v37, 0.0 }
 0x1ae   : > { %v591_v58 = vmin.f32 %v587_v51, %v1588_v47 }
 0x1b3   : > { %v556_v28 = vpop.f32.mrf.mxu3 }
 0x1b4   : > { %v1599_v53 = vmax.f32 %v556_v28, 0.0 }
 0x1b6   : > { %v592_v61 = vmin.f32 %v588_v55, %v1599_v53 }
 0x1bb   : > { %v559_v31 = vpop.f32.mrf.mxu3 }
 0x1bc   : > { %v1590_v48 = vmax.f32 %v559_v31, 0.0 }
 0x1be   : > { %v593_v59 = vmin.f32 %v589_v52, %v1590_v48 }
 0x1c0   : > { %v596_v0 = vmin.f32 %v592_v61, %v593_v59 }
 0x1c3   : > { %v562_v33 = vpop.f32.mrf.mxu3 }
 0x1c4   : > { %v1601_v54 = vmax.f32 %v562_v33, 0.0 }
 0x1c6   : > { %v594_v62 = vmin.f32 %v590_v57, %v1601_v54 }
 0x1cb   : > { %v565_v56 = vpop.f32.mrf.mxu3 }
 0x1cc   : > { %v1607_v60 = vmax.f32 %v565_v56, 0.0 }
 0x1ce   : > { %v595_v63 = vmin.f32 %v591_v58, %v1607_v60 }
 0x1d0   : > { %v597_v1 = vmin.f32 %v594_v62, %v595_v63 }
 0x1d2   : > { %v598_v2 = vmin.f32 %v596_v0, %v597_v1 }
 0x1d4   : > { %v599_v3 = vrot.slane %v598_v2, 4 }
 0x1d6   : > { %v600_v4 = vmin.f32 %v598_v2, %v599_v3 }
 0x1d8   : > { %v601_v5 = vrot.slane %v600_v4, 2 }
 0x1da   : > { %v602_v6 = vmin.f32 %v600_v4, %v601_v5 }
 0x1dc   : > { %v603_v7 = vrot.slane %v602_v6, 1 }
 0x1de   : > { %v1612_v8 = vmin.f32 %v602_v6, %v603_v7 }
 0x1e0   : > { %vm2174_vm1 = vcmp.le.f32.partialorder %v1580_v43, %v1612_v8  ;;  %vm2178_vm2 = vcmp.le.f32.partialorder %v1572_v39, %v1612_v8  ;;  %vm616_vm3 = vcmp.le.f32.partialorder %v1588_v47, %v1612_v8  ;;  %vm2173_vm4 = vcmp.le.f32.partialorder %v1576_v41, %v1612_v8 }
 0x1e1   : > { %v1622_v9 = vsel %vm2174_vm1, 1e+30, %v1580_v43  ;;  %v1628_v10 = vsel %vm2178_vm2, 1e+30, %v1572_v39  ;;  %vm2172_vm5 = vcmp.le.f32.partialorder %v1570_v38, %v1612_v8  ;;  %vm2175_vm6 = vcmp.le.f32.partialorder %v1578_v42, %v1612_v8 }
 0x1e2   : > { %v674_v11 = vmin.f32 %v1622_v9, %v1628_v10  ;;  %vm2177_vm7 = vcmp.le.f32.partialorder %v1566_v35, %v1612_v8  ;;  %vm2176_vm8 = vcmp.le.f32.partialorder %v1564_v34, %v1612_v8  ;;  %vm2179_vm9 = vcmp.le.f32.partialorder %v1568_v36, %v1612_v8 }
 0x1e3   : > { %vm620_vm10 = vcmp.le.f32.partialorder %v1607_v60, %v1612_v8  ;;  %v1652_v12 = vsel %vm616_vm3, 1e+30, %v1588_v47  ;;  %vm2181_vm11 = vcmp.le.f32.partialorder %v1582_v44, %v1612_v8  ;;  %v1660_v13 = vsel %vm2173_vm4, 1e+30, %v1576_v41 }
 0x1e4   : > { %v1666_v14 = vsel %vm2172_vm5, 1e+30, %v1570_v38  ;;  %v1672_v15 = vsel %vm2175_vm6, 1e+30, %v1578_v42  ;;  %vm2180_vm12 = vcmp.le.f32.partialorder %v1574_v40, %v1612_v8  ;;  %v1680_v16 = vsel %vm2177_vm7, 1e+30, %v1566_v35 }
 0x1e5   : > { %v1686_v17 = vsel %vm2176_vm8, 1e+30, %v1564_v34  ;;  %v1692_v18 = vsel %vm2179_vm9, 1e+30, %v1568_v36  ;;  %v678_v19 = vmin.f32 %v674_v11, %v1652_v12  ;;  %vm615_vm13 = vcmp.le.f32.partialorder %v1586_v46, %v1612_v8 }
 0x1e6   : > { %vm617_vm14 = vcmp.le.f32.partialorder %v1599_v53, %v1612_v8  ;;  %v671_v20 = vmin.f32 %v1660_v13, %v1680_v16  ;;  %vm618_vm15 = vcmp.le.f32.partialorder %v1590_v48, %v1612_v8  ;;  %v1707_v21 = vsel %vm2181_vm11, 1e+30, %v1582_v44 }
 0x1e7   : > { %v672_v22 = vmin.f32 %v1666_v14, %v1686_v17  ;;  %vm619_vm0 = vcmp.le.f32.partialorder %v1601_v54, %v1612_v8  ;;  %v1717_v23 = vsel %vm2180_vm12, 1e+30, %v1574_v40  ;;  %v673_v24 = vmin.f32 %v1672_v15, %v1692_v18 }
 0x1e8   : > { %v675_v25 = vmin.f32 %v671_v20, %v1707_v21  ;;  %v1726_v26 = vsel %vm620_vm10, 1e+30, %v1607_v60  ;;  %v1732_v27 = vsel %vm615_vm13, 1e+30, %v1586_v46  ;;  %v1738_v28 = vsel %vm617_vm14, 1e+30, %v1599_v53 }
 0x1e9   : > { %v676_v29 = vmin.f32 %v672_v22, %v1717_v23  ;;  %v682_v30 = vmin.f32 %v678_v19, %v1726_v26  ;;  %v1746_v31 = vsel %vm618_vm15, 1e+30, %v1590_v48  ;;  %v677_v32 = vmin.f32 %v673_v24, %v1732_v27 }
 0x1ea   : > { %v679_v33 = vmin.f32 %v675_v25, %v1738_v28  ;;  %v1754_v37 = vsel %vm619_vm0, 1e+30, %v1601_v54  ;;  %v621_v62 = vmax.f32 %v1612_v8, 1e-16 }
 0x1eb   : > { %v680_v45 = vmin.f32 %v676_v29, %v1746_v31  ;;  %v681_v49 = vmin.f32 %v677_v32, %v1754_v37 }
 0x1ec   : > { %1262 = vrcp.f32 %v621_v62 }
 0x1ed   : > { %v683_v50 = vmin.f32 %v679_v33, %v680_v45  ;;  %v684_v51 = vmin.f32 %v681_v49, %v682_v30 }
 0x1ef   : > { %v685_v52 = vmin.f32 %v683_v50, %v684_v51 }
 0x1f1   : > { %v686_v55 = vrot.slane %v685_v52, 4 }
 0x1f3   : > { %v687_v56 = vmin.f32 %v685_v52, %v686_v55 }
 0x1f5   : > { %v688_v57 = vrot.slane %v687_v56, 2 }
 0x1f7   : > { %v689_v58 = vmin.f32 %v687_v56, %v688_v57 }
 0x1f9   : > { %v690_v59 = vrot.slane %v689_v58, 1 }
 0x1fb   : > { %v1758_v61 = vmin.f32 %v689_v58, %v690_v59 }
 0x1fd   : > { %vm2183_vm5 = vcmp.le.f32.partialorder %v1660_v13, %v1758_v61  ;;  %vm2182_vm4 = vcmp.le.f32.partialorder %v1666_v14, %v1758_v61  ;;  %vm2185_vm1 = vcmp.le.f32.partialorder %v1672_v15, %v1758_v61  ;;  %vm2184_vm6 = vcmp.le.f32.partialorder %v1622_v9, %v1758_v61 }
 0x1fe   : > { %vm2187_vm8 = vcmp.le.f32.partialorder %v1680_v16, %v1758_v61  ;;  %vm2186_vm7 = vcmp.le.f32.partialorder %v1686_v17, %v1758_v61  ;;  %vm698_vm2 = vcmp.le.f32.partialorder %v1692_v18, %v1758_v61  ;;  %vm699_vm9 = vcmp.le.f32.partialorder %v1628_v10, %v1758_v61 }
 0x1ff   : > { %vm700_vm12 = vcmp.le.f32.partialorder %v1707_v21, %v1758_v61  ;;  %v1783_v63 = vsel %vm2183_vm5, 1e+30, %v1660_v13  ;;  %v1789_v0 = vsel %vm2182_vm4, 1e+30, %v1666_v14  ;;  %vm701_vm11 = vcmp.le.f32.partialorder %v1717_v23, %v1758_v61 }
 0x200   : > { %2200 = vst [vmem:[#allocation12_spill] sm:$0xff] %v1783_v63  ;;  %v1797_v1 = vsel %vm2185_vm1, 1e+30, %v1672_v15  ;;  %v1803_v2 = vsel %vm2184_vm6, 1e+30, %v1622_v9  ;;  %vm702_vm4 = vcmp.le.f32.partialorder %v1732_v27, %v1758_v61  ;;  %vm703_vm5 = vcmp.le.f32.partialorder %v1652_v12, %v1758_v61 }
 0x201   : > { %2201 = vst [vmem:[#allocation13_spill] sm:$0xff] %v1789_v0  ;;  %v1809_v3 = vsel %vm2187_vm8, 1e+30, %v1680_v16  ;;  %v1817_v4 = vsel %vm2186_vm7, 1e+30, %v1686_v17  ;;  %vm704_vm6 = vcmp.le.f32.partialorder %v1738_v28, %v1758_v61  ;;  %vm705_vm1 = vcmp.le.f32.partialorder %v1746_v31, %v1758_v61 }
 0x202   : > { %2202 = vst [vmem:[#allocation14_spill] sm:$0xff] %v1797_v1  ;;  %v1823_v5 = vsel %vm698_vm2, 1e+30, %v1692_v18  ;;  %v1829_v6 = vsel %vm699_vm9, 1e+30, %v1628_v10  ;;  %v758_v7 = vmin.f32 %v1783_v63, %v1809_v3  ;;  %vm706_vm7 = vcmp.le.f32.partialorder %v1754_v37, %v1758_v61 }
 0x203   : > { %2203 = vst [vmem:[#allocation15_spill] sm:$0xff] %v1803_v2  ;;  %vm707_vm8 = vcmp.le.f32.partialorder %v1726_v26, %v1758_v61  ;;  %v708_v11 = vmax.f32 %v1758_v61, 1e-16  ;;  %v759_v19 = vmin.f32 %v1789_v0, %v1817_v4  ;;  %v1850_v20 = vsel %vm700_vm12, 1e+30, %v1707_v21 }
 0x204   : > { %v1856_v22 = vsel %vm701_vm11, 1e+30, %v1717_v23  ;;  %v760_v24 = vmin.f32 %v1797_v1, %v1823_v5  ;;  %v761_v25 = vmin.f32 %v1803_v2, %v1829_v6  ;;  %v1866_v29 = vsel %vm702_vm4, 1e+30, %v1732_v27 }
 0x205   : > { %v1872_v30 = vsel %vm703_vm5, 1e+30, %v1652_v12  ;;  %v762_v32 = vmin.f32 %v758_v7, %v1850_v20  ;;  %v763_v33 = vmin.f32 %v759_v19, %v1856_v22  ;;  %v1880_v45 = vsel %vm704_vm6, 1e+30, %v1738_v28 }
 0x206   : > { %v1886_v49 = vsel %vm705_vm1, 1e+30, %v1746_v31  ;;  %v764_v50 = vmin.f32 %v760_v24, %v1866_v29  ;;  %v765_v51 = vmin.f32 %v761_v25, %v1872_v30  ;;  %v1894_v52 = vsel %vm706_vm7, 1e+30, %v1754_v37  ;;  %v1263_v25 = vpop.eup %1262 }
 0x207   : > { %v1900_v55 = vsel %vm707_vm8, 1e+30, %v1726_v26  ;;  %v766_v56 = vmin.f32 %v762_v32, %v1880_v45  ;;  %v767_v57 = vmin.f32 %v763_v33, %v1886_v49  ;;  %1264 = vrcp.f32 %v708_v11 }
 0x208   : > { %v768_v58 = vmin.f32 %v764_v50, %v1894_v52  ;;  %v769_v59 = vmin.f32 %v765_v51, %v1900_v55  ;;  %v637_v1 = vsel %vm619_vm0, %v1263_v25, 0.0  ;;  %v638_v62 = vsel %vm620_vm10, %v1263_v25, 0.0 }
 0x209   : > { %v770_v7 = vmin.f32 %v766_v56, %v767_v57  ;;  %v635_v33 = vsel %vm617_vm14, %v1263_v25, 0.0  ;;  %v636_v11 = vsel %vm618_vm15, %v1263_v25, 0.0  ;;  %v634_v54 = vsel %vm616_vm3, %v1263_v25, 0.0 }
 0x20a   : > { %v771_v19 = vmin.f32 %v768_v58, %v769_v59  ;;  %vm2204_vm10 = vcmp.le.f32.partialorder %v1582_v44, %v1612_v8  ;;  %vm2205_vm0 = vcmp.le.f32.partialorder %v1574_v40, %v1612_v8  ;;  %vm2207_vm3 = vcmp.le.f32.partialorder %v1572_v39, %v1612_v8 }
 0x20b   : > { %v631_v60 = vsel %vm2204_vm10, %v1263_v25, 0.0  ;;  %v632_v53 = vsel %vm2205_vm0, %v1263_v25, 0.0  ;;  %v630_v47 = vsel %vm2207_vm3, %v1263_v25, 0.0  ;;  %vm2212_vm14 = vcmp.le.f32.partialorder %v1576_v41, %v1612_v8 }
 0x20c   : > { %v772_v24 = vmin.f32 %v770_v7, %v771_v19  ;;  %vm2217_vm15 = vcmp.le.f32.partialorder %v1622_v9, %v1758_v61 }
 0x20d   : > { %v1265_v2 = vpop.eup %1264 }
 0x20e   : > { %v773_v0 = vrot.slane %v772_v24, 4  ;;  %v724_v48 = vsel %vm706_vm7, %v1265_v2, 0.0  ;;  %v725_v44 = vsel %vm707_vm8, %v1265_v2, 0.0  ;;  %v722_v40 = vsel %vm704_vm6, %v1265_v2, 0.0 }
 0x20f   : > { %v723_v37 = vsel %vm705_vm1, %v1265_v2, 0.0  ;;  %vm2208_vm7 = vcmp.le.f32.partialorder %v1566_v35, %v1612_v8  ;;  %v720_v39 = vsel %vm702_vm4, %v1265_v2, 0.0  ;;  %vm2209_vm8 = vcmp.le.f32.partialorder %v1564_v34, %v1612_v8 }
 0x210   : > { %v774_v63 = vmin.f32 %v772_v24, %v773_v0  ;;  %v633_v0 = vsel %vm615_vm13, %v1263_v25, 0.0  ;;  %vm2206_vm13 = vcmp.le.f32.partialorder %v1568_v36, %v1612_v8  ;;  %v627_v36 = vsel %vm2208_vm7, %v1263_v25, 0.0 }
 0x211   : > { %v629_v46 = vsel %vm2206_vm13, %v1263_v25, 0.0  ;;  %v628_v26 = vsel %vm2209_vm8, %v1263_v25, 0.0  ;;  %vm2210_vm6 = vcmp.le.f32.partialorder %v1578_v42, %v1612_v8  ;;  %v740_v51 = vadd.f32 %v724_v48, %v637_v1 }
 0x212   : > { %v775_v32 = vrot.slane %v774_v63, 2  ;;  %v625_v28 = vsel %vm2210_vm6, %v1263_v25, 0.0  ;;  %vm2211_vm1 = vcmp.le.f32.partialorder %v1580_v43, %v1612_v8  ;;  %v623_v35 = vsel %vm2212_vm14, %v1263_v25, 0.0 }
 0x213   : > { %v626_v31 = vsel %vm2211_vm1, %v1263_v25, 0.0  ;;  %vm2213_vm4 = vcmp.le.f32.partialorder %v1570_v38, %v1612_v8  ;;  %v741_v56 = vadd.f32 %v725_v44, %v638_v62  ;;  %v738_v57 = vadd.f32 %v722_v40, %v635_v33 }
 0x214   : > { %v776_v50 = vmin.f32 %v774_v63, %v775_v32  ;;  %v624_v27 = vsel %vm2213_vm4, %v1263_v25, 0.0  ;;  %v739_v58 = vadd.f32 %v723_v37, %v636_v11  ;;  %v721_v42 = vsel %vm703_vm5, %v1265_v2, 0.0  ;;  %v2222_v11 = vld [vmem:[#allocation12_spill] sm:$0xff] }
 0x215   : > { %v736_v1 = vadd.f32 %v720_v39, %v633_v0  ;;  %v718_v43 = vsel %vm700_vm12, %v1265_v2, 0.0  ;;  %v719_v41 = vsel %vm701_vm11, %v1265_v2, 0.0  ;;  %v716_v8 = vsel %vm698_vm2, %v1265_v2, 0.0 }
 0x216   : > { %v777_v63 = vrot.slane %v776_v50, 1  ;;  %v717_v12 = vsel %vm699_vm9, %v1265_v2, 0.0  ;;  %vm2214_vm5 = vcmp.le.f32.partialorder %v1680_v16, %v1758_v61  ;;  %vm2215_vm12 = vcmp.le.f32.partialorder %v1686_v17, %v1758_v61 }
 0x217   : > { %v714_v59 = vsel %vm2214_vm5, %v1265_v2, 0.0  ;;  %v715_v21 = vsel %vm2215_vm12, %v1265_v2, 0.0  ;;  %vm2216_vm11 = vcmp.le.f32.partialorder %v1672_v15, %v1758_v61  ;;  %v713_v18 = vsel %vm2217_vm15, %v1265_v2, 0.0 }
 0x218   : > { %v1969_v34 = vmin.f32 %v776_v50, %v777_v63  ;;  %v712_v23 = vsel %vm2216_vm11, %v1265_v2, 0.0  ;;  %vm2218_vm2 = vcmp.le.f32.partialorder %v1660_v13, %v1758_v61  ;;  %v737_v7 = vadd.f32 %v721_v42, %v634_v54 }
 0x219   : > { %v710_v10 = vsel %vm2218_vm2, %v1265_v2, 0.0  ;;  %v734_v16 = vadd.f32 %v718_v43, %v631_v60  ;;  %vm2219_vm9 = vcmp.le.f32.partialorder %v1666_v14, %v1758_v61  ;;  %v735_v19 = vadd.f32 %v719_v41, %v632_v53  ;;  %v2220_v61 = vld [vmem:[#allocation14_spill] sm:$0xff] }
 0x21a   : > { %v795_v38 = vmax.f32 %v1969_v34, 1e-16  ;;  %v711_v17 = vsel %vm2219_vm9, %v1265_v2, 0.0  ;;  %v732_v24 = vadd.f32 %v716_v8, %v629_v46  ;;  %v733_v25 = vadd.f32 %v717_v12, %v630_v47  ;;  %v2221_v2 = vld [vmem:[#allocation15_spill] sm:$0xff]  ;;  %v1184_v12 = vld [vmem:[#allocation5] sm:$0xff] }
 0x21b   : > { %v730_v15 = vadd.f32 %v714_v59, %v627_v36  ;;  %v731_v62 = vadd.f32 %v715_v21, %v628_v26  ;;  %v728_v32 = vadd.f32 %v712_v23, %v625_v28  ;;  %v729_v33 = vadd.f32 %v713_v18, %v626_v31  ;;  %v2223_v36 = vld [vmem:[#allocation13_spill] sm:$0xff]  ;;  %v1189_v23 = vld [vmem:[%s361_s22] sm:$0xff] }
 0x21c   : > { %1266 = vrcp.f32 %v795_v38  ;;  %v726_v9 = vadd.f32 %v710_v10, %v623_v35  ;;  %vm793_vm10 = vcmp.le.f32.partialorder %v1894_v52, %v1969_v34  ;;  %vm794_vm0 = vcmp.le.f32.partialorder %v1900_v55, %v1969_v34  ;;  %v436_v59 = vld [vmem:[#allocation5 + $0x8] sm:$0x1]  ;;  %928 = vmatpush.bf16.msrb.mxu2 %v1189_v23  ;;  %v448_v10 = vld [vmem:[%s2168_s5 + $0x18] sm:$0xff] }
 0x21d   : > { %vm791_vm13 = vcmp.le.f32.partialorder %v1880_v45, %v1969_v34  ;;  %v727_v13 = vadd.f32 %v711_v17, %v624_v27  ;;  %vm792_vm3 = vcmp.le.f32.partialorder %v1886_v49, %v1969_v34  ;;  %vm789_vm7 = vcmp.le.f32.partialorder %v1866_v29, %v1969_v34 }
 0x21e   : > { %vm790_vm8 = vcmp.le.f32.partialorder %v1872_v30, %v1969_v34  ;;  %vm787_vm6 = vcmp.le.f32.partialorder %v1850_v20, %v1969_v34  ;;  %vm788_vm1 = vcmp.le.f32.partialorder %v1856_v22, %v1969_v34  ;;  %vm785_vm14 = vcmp.le.f32.partialorder %v1823_v5, %v1969_v34 }
 0x21f   : > { %vm786_vm4 = vcmp.le.f32.partialorder %v1829_v6, %v1969_v34  ;;  %vm783_vm5 = vcmp.le.f32.partialorder %v1809_v3, %v1969_v34  ;;  %vm784_vm12 = vcmp.le.f32.partialorder %v1817_v4, %v1969_v34  ;;  %vm781_vm11 = vcmp.le.f32.partialorder %v2220_v61, %v1969_v34 }
 0x220   : > { %vm782_vm15 = vcmp.le.f32.partialorder %v2221_v2, %v1969_v34  ;;  %vm779_vm2 = vcmp.le.f32.partialorder %v2222_v11, %v1969_v34  ;;  %vm780_vm9 = vcmp.le.f32.partialorder %v2223_v36, %v1969_v34  ;;  %v842_v21 = vunpack.c.l.b16 %v436_v59  ;;  %v449_v2 = vld [vmem:[%s2170_s7] sm:$0xff] }
 0x222   : > { %v1267_v14 = vpop.eup %1266  ;;  %v844_v34 = vpack.c.b16 %v842_v21, %v842_v21 }
 0x223   : > { %v811_v0 = vsel %vm793_vm10, %v1267_v14, 0.0  ;;  %v812_v54 = vsel %vm794_vm0, %v1267_v14, 0.0  ;;  %v809_v60 = vsel %vm791_vm13, %v1267_v14, 0.0  ;;  %v810_v53 = vsel %vm792_vm3, %v1267_v14, 0.0 }
 0x224   : > { %v827_v48 = vadd.f32 %v811_v0, %v740_v51  ;;  %v828_v50 = vadd.f32 %v812_v54, %v741_v56  ;;  %v825_v46 = vadd.f32 %v809_v60, %v738_v57  ;;  %v826_v47 = vadd.f32 %v810_v53, %v739_v58  ;;  %v1185_v60 = vld [vmem:[%s2167_s4] sm:$0xff]  ;;  %v452_v53 = vld [vmem:[%s2170_s7 + $0x18] sm:$0xff] }
 0x225   : > { %v807_v52 = vsel %vm789_vm7, %v1267_v14, 0.0  ;;  %v808_v55 = vsel %vm790_vm8, %v1267_v14, 0.0  ;;  %v805_v45 = vsel %vm787_vm6, %v1267_v14, 0.0  ;;  %v806_v49 = vsel %vm788_vm1, %v1267_v14, 0.0 }
 0x226   : > { %v836_v44 = vpack.c.bf16 %v828_v50, %v827_v48  ;;  %v835_v40 = vpack.c.bf16 %v826_v47, %v825_v46  ;;  %v823_v37 = vadd.f32 %v807_v52, %v736_v1  ;;  %v821_v29 = vadd.f32 %v805_v45, %v734_v16  ;;  %v451_v48 = vld [vmem:[%s2170_s7 + $0x10] sm:$0xff]  ;;  %v1186_v50 = vld [vmem:[%s2167_s4 + $0x8] sm:$0xff] }
 0x227   : > { %v822_v63 = vadd.f32 %v806_v49, %v735_v19  ;;  %v803_v30 = vsel %vm785_vm14, %v1267_v14, 0.0  ;;  %v804_v20 = vsel %vm786_vm4, %v1267_v14, 0.0  ;;  %v824_v39 = vadd.f32 %v808_v55, %v737_v7  ;;  %v445_v19 = vld [vmem:[%s2168_s5] sm:$0xff] }
 0x228   : > { %847 = vmatpush.bf16.msra.mxu1 %v836_v44  ;;  %v819_v22 = vadd.f32 %v803_v30, %v732_v24  ;;  %v820_v26 = vadd.f32 %v804_v20, %v733_v25  ;;  %v801_v28 = vsel %vm783_vm5, %v1267_v14, 0.0  ;;  %v802_v31 = vsel %vm784_vm12, %v1267_v14, 0.0  ;;  %v447_v24 = vld [vmem:[%s2168_s5 + $0x10] sm:$0xff]  ;;  %v446_v25 = vld [vmem:[%s2168_s5 + $0x8] sm:$0xff] }
 0x229   : > { %v833_v51 = vpack.c.bf16 %v822_v63, %v821_v29  ;;  %v817_v35 = vadd.f32 %v801_v28, %v730_v15  ;;  %v799_v5 = vsel %vm781_vm11, %v1267_v14, 0.0  ;;  %v818_v27 = vadd.f32 %v802_v31, %v731_v62  ;;  %v1188_v31 = vld [vmem:[%s2169_s6 + $0x8] sm:$0xff] }
 0x22a   : > { %v832_v6 = vpack.c.bf16 %v820_v26, %v819_v22  ;;  %v800_v56 = vsel %vm782_vm15, %v1267_v14, 0.0  ;;  %v815_v57 = vadd.f32 %v799_v5, %v728_v32  ;;  %v797_v3 = vsel %vm779_vm2, %v1267_v14, 0.0 }
 0x22b   : > { %v816_v58 = vadd.f32 %v800_v56, %v729_v33  ;;  %v798_v4 = vsel %vm780_vm9, %v1267_v14, 0.0  ;;  %v831_v42 = vpack.c.bf16 %v818_v27, %v817_v35  ;;  %v813_v1 = vadd.f32 %v797_v3, %v726_v9 }
 0x22c   : > { %848 = vmatpush.bf16.msra.mxu1 %v835_v40  ;;  %v814_v43 = vadd.f32 %v798_v4, %v727_v13  ;;  %v834_v38 = vpack.c.bf16 %v824_v39, %v823_v37  ;;  %v1406_v7 = vmov 0   ;;  %v450_v13 = vld [vmem:[%s2170_s7 + $0x8] sm:$0xff]  ;;  %vm915_vm10 = vcmask 261120  }
 0x22d   : > { %v830_v41 = vpack.c.bf16 %v816_v58, %v815_v57  ;;  %1260 = vset.pattern.permute.xlu1 %v1406_v7  ;;  %1259 = vset.pattern.permute.xlu0 %v1406_v7 }
 0x22e   : > { %v829_v8 = vpack.c.bf16 %v814_v43, %v813_v1  ;;  %902 = vperm.xlu1 %1260, %v448_v10   ;;  %1261 = vset.pattern.permute.xlu2 %v1406_v7 }
 0x22f   : > { %897 = vperm.xlu0 %1259, %v447_v24   ;;  %892 = vperm.xlu2 %1261, %v446_v25  }
 0x230   : > { %849 = vmatpush.bf16.msra.mxu1 %v834_v38 }
 0x234   : > { %850 = vmatpush.bf16.msra.mxu1 %v833_v51  ;;  %v1187_v51 = vld [vmem:[%s2169_s6] sm:$0xff] }
 0x236   : > { %887 = vperm.xlu1 %1260, %v445_v19  }
 0x237   : > { %949 = vperm.xlu2 %1261, %v449_v2  }
 0x238   : > { %851 = vmatpush.bf16.msra.mxu1 %v832_v6 }
 0x23c   : > { %852 = vmatpush.bf16.msra.mxu1 %v831_v42 }
 0x23e   : > { %954 = vperm.xlu1 %1260, %v450_v13  }
 0x23f   : > { %959 = vperm.xlu2 %1261, %v451_v48  }
 0x240   : > { %853 = vmatpush.bf16.msra.mxu1 %v830_v41 }
 0x244   : > { %854 = vmatpush.bf16.msra.mxu1 %v829_v8 }
 0x246   : > { %964 = vperm.xlu1 %1260, %v452_v53  }
 0x247   : > { %855 = vmatmul.bf16.vlgmr.msra.gmra.mxu1 %v1184_v12 }
 0x257   : > { %860 = vmatmul.bf16.gmra.mxu1 %v844_v34 }
 0x289   : > { %v893_v49 = vpop.permute.xlu2 %892 }
 0x291   : > { %v950_v35 = vpop.permute.xlu2 %949 }
 0x299   : > { %v960_v58 = vpop.permute.xlu2 %959 }
 0x2a0   : > { %v903_v52 = vpop.permute.xlu1 %902 }
 0x2a1   : > { %v898_v45 = vpop.permute.xlu0 %897 }
 0x2a8   : > { %v888_v40 = vpop.permute.xlu1 %887 }
 0x2b0   : > { %v955_v27 = vpop.permute.xlu1 %954 }
 0x2b8   : > { %v965_v42 = vpop.permute.xlu1 %964 }
 0x2c4   : > { %v856_v18 = vpop.f32.mrf.mxu1 }
 0x2cc   : > { %v858_v16 = vpop.f32.mrf.mxu1 }
 0x2d4   : > { %v861_v17 = vpop.f32.mrf.mxu1 }
 0x2d5   : > { %1268 = vrcp.f32 %v861_v17 }
 0x2db   : > { %v1269_v15 = vpop.eup %1268 }
 0x2dc   : > { %v866_v62 = vperm.slane %v1269_v15, 0  ;;  %v863_v32 = vpop.f32.mrf.mxu1 }
 0x2de   : > { %v867_v33 = vmul.f32 %v866_v62, %v856_v18  ;;  %v868_v9 = vmul.f32 %v866_v62, %v858_v16 }
 0x2e0   : > { %v869_v14 = vpack.c.bf16 %v867_v33, %v867_v33  ;;  %v870_v61 = vpack.c.bf16 %v868_v9, %v868_v9 }
 0x2e2   : > { %v875_v11 = vunpack.c.l.b16 %v869_v14  ;;  %v876_v0 = vunpack.c.l.b16 %v870_v61 }
 0x2e4   : > { %v877_v54 = vpack.c.b16 %v876_v0, %v875_v11 }
 0x2e6   : > { %929 = vmatpush.bf16.msrb.mxu2 %v877_v54 }
 0x2e9   : > { %1168 = vmatmul.msk.bf16.vlgmr.msrb.gmra.mxu2 %vm915_vm10, %v1185_v60 }
 0x2f9   : > { %1169 = vmatmul.msk.bf16.gmra.mxu2 %vm915_vm10, %v1186_v50 }
 0x36c   : > { %v931_v46 = vpop.f32.mrf.mxu2 }
 0x36d   : > { %v932_v63 = vadd.f32 %v931_v46, %v888_v40 }
 0x36f   : > { %v941_v26 = vmax.f32 %v932_v63, 0.0 }
 0x374   : > { %v933_v47 = vpop.f32.mrf.mxu2 }
 0x375   : > { %v934_v36 = vadd.f32 %v933_v47, %v893_v49 }
 0x377   : > { %v942_v39 = vmax.f32 %v934_v36, 0.0 }
 0x379   : > { %v945_v28 = vpack.c.bf16 %v942_v39, %v941_v26 }
 0x37c   : > { %v936_v55 = vpop.f32.mrf.mxu2 }
 0x37d   : > { %v937_v44 = vadd.f32 %v936_v55, %v898_v45 }
 0x37f   : > { %v943_v30 = vmax.f32 %v937_v44, 0.0 }
 0x384   : > { %v938_v37 = vpop.f32.mrf.mxu2 }
 0x385   : > { %v939_v29 = vadd.f32 %v938_v37, %v903_v52 }
 0x387   : > { %v944_v20 = vmax.f32 %v939_v29, 0.0 }
 0x389   : > { %v946_v22 = vpack.c.bf16 %v944_v20, %v943_v30 }
 0x38b   : > { %989 = vmatpush.bf16.msrb.mxu3 %v946_v22 }
 0x38f   : > { %990 = vmatpush.bf16.msrb.mxu3 %v945_v28 }
 0x392   : > { %1178 = vmatmul.msk.bf16.vlgmr.msrb.gmra.mxu3 %vm915_vm10, %v1187_v51 }
 0x3a2   : > { %1179 = vmatmul.msk.bf16.gmra.mxu3 %vm915_vm10, %v1188_v31 }
 0x415   : > { %v992_v5 = vpop.f32.mrf.mxu3 }
 0x416   : > { %v993_v6 = vadd.f32 %v992_v5, %v950_v35 }
 0x418   : > { %1002 = vst [vmem:[%s395_s25] sm:$0xff] %v993_v6 }
 0x41d   : > { %v994_v56 = vpop.f32.mrf.mxu3 }
 0x41e   : > { %v995_v57 = vadd.f32 %v994_v56, %v955_v27 }
 0x420   : > { %1003 = vst [vmem:[%s395_s25 + $0x8] sm:$0xff] %v995_v57 }
 0x425   : > { %v997_v3 = vpop.f32.mrf.mxu3 }
 0x426   : > { %v998_v4 = vadd.f32 %v997_v3, %v960_v58 }
 0x428   : > { %1004 = vst [vmem:[%s395_s25 + $0x10] sm:$0xff] %v998_v4 }
 0x42d   : > { %v999_v1 = vpop.f32.mrf.mxu3 }
 0x42e   : > { %v1000_v43 = vadd.f32 %v999_v1, %v965_v42 }
 0x430   : > { %1005 = vst [vmem:[%s395_s25 + $0x18] sm:$0xff] %v1000_v43 }
 0x431   : > { %1357 = shalt.err (!%p1354_p11)
}
 0x432   : > { %s1407_s19 = smov 128   ;;  %s1408_s25 = smov 256  }
 0x433   : > { %s1409_s23 = smov 8  }
 0x434   : > { %1200 = dma.vmem_to_hbm [thread:$0]  (%p1498_p6), %s1019_s26, 512, %s1021_s12, %s1007_s18, %s1407_s19, %s1408_s25, %s1409_s23  }
 0x435 PF: > { %s1035_s15 = sand.u32 1, %s1388_s27   ;;  %p1210_p12 = pnand %p1127_p1, %p1504_p10 }
 0x436   : > { %s1036_s13 = scalar_lea.sflag [#allocation4], %s1035_s15 }
 0x437   : > { %p1211_p13 = pneg %p1210_p12 }
 0x439   : > { %1383 = dma.done.wait (%p1211_p13), %s1036_s13, 512  }
 0x43a   : > { %1385 = vsyncadd (%p1211_p13), %s1036_s13, 4294966784  ;;  %p20_p0 = scmp.ge.s32.totalorder %s1480_s11, 4   ;;  %s2224_s27 = smov %s1392_s28 }
 0x43b   : > { %s2225_s28 = smov %s1396_s29  ;;  %s2226_s29 = smov %s1492_s14 }
 0x43c   : > { %s2227_s30 = smov %s1480_s11  ;;  %22 = sbr.rel (!%p20_p0) target bundleno = 5 (0x5), region = 145 }
 0x441   :  { %1042 = vsyncpa [#allocation3], 1 }
 0x442   :  { %1044 = vsyncpa [#allocation3 + $0x1], 1 }
 0x443   :  { %1045 = vsyncpa [#allocation6], 1 }
 0x444   :  { %1046 = vsyncpa [#allocation4], 1 }
 0x445   :  { %1048 = vsyncpa [#allocation4 + $0x1], 1 }

</bundles_post_ra>
